<compile_context>
chip_gen: v7x
topology: tpu7x:2x2x1
jax: 0.10.0
libtpu: 0.0.40
codegen_flags: <defaults>
</compile_context>

<pallas_src>
import jax
import jax.numpy as jnp
from jax import lax
from jax.experimental import pallas as pl
from jax.experimental.pallas import tpu as pltpu


def _round_up(x, m):
    return ((x + m - 1) // m) * m


def _make_mlp_kernel(layer_dims, mxu_dtype):
    """Kernel fusing all Linear(+ReLU) layers.

    layer_dims: static list of (out_features, in_features) per layer.
    Operands: x_ref (tn, p) batch-major block,
              w_ref (n_layers, F_out_pad, F_in_pad) weight slab,
              b_ref (n_layers, F_out_pad, 1) bias slab,
              o_ref (D, tn) lane-dense output block.
    """
    n_layers = len(layer_dims)

    def kernel(x_ref, w_ref, b_ref, o_ref):
        x = x_ref[...]                                     # (tn, p)
        if x.dtype != mxu_dtype:
            x = x.astype(mxu_dtype)
        fout0, fin0 = layer_dims[0]
        w0 = w_ref[0, :fout0, :fin0]                       # (K, p), already mxu_dtype
        # First layer: fold the x transpose into the contraction (w @ x.T).
        h = lax.dot_general(w0, x, (((1,), (1,)), ((), ())),
                            preferred_element_type=jnp.float32)
        h = h + b_ref[0, :fout0, :]                        # f32 bias add (VPU)
        for i in range(1, n_layers):
            h = jnp.maximum(h, 0.0)                        # ReLU between layers, f32
            fout, fin = layer_dims[i]
            w = w_ref[i, :fout, :fin]
            rhs = h if h.dtype == mxu_dtype else h.astype(mxu_dtype)
            h = jnp.dot(w, rhs, preferred_element_type=jnp.float32)
            h = h + b_ref[i, :fout, :]
        o_ref[...] = h.astype(o_ref.dtype)                 # (D, tn) unmasked store

    return kernel


def feedforward_pallas(x, weights, biases, *, batch_tile=1024,
                       mxu_dtype=jnp.float32):
    """Fused MLP forward pass.

    x:        (B, p) float32
    weights:  list of (out_features, in_features) float32 arrays (PyTorch layout)
    biases:   list of (out_features,) float32 arrays
    """
    assert batch_tile % 128 == 0
    assert x.dtype == jnp.float32, "expected f32 activations"
    B, p = x.shape
    n_layers = len(weights)
    layer_dims = [tuple(w.shape) for w in weights]         # (fout, fin), static
    assert layer_dims[0][1] == p
    D = layer_dims[-1][0]

    # ---- batch padding & tiling -----------------------------------------
    # Pad only to the next 128-lane multiple; pick tn as a divisor of that.
    B_pad = _round_up(B, 128)
    n128 = B_pad // 128
    max_t = max(1, min(batch_tile // 128, n128))
    if n128 >= 2:
        # >= 2 grid steps so both v7x TensorCores run; extra ~0.35us/step is
        # negligible on single-TC v5e/v6e (pass a larger batch_tile there).
        max_t = max(1, min(max_t, n128 // 2))
    t = max(d for d in range(1, max_t + 1) if n128 % d == 0)
    tn = 128 * t
    grid = (n128 // t,)

    if B_pad != B:
        x = jnp.pad(x, ((0, B_pad - B), (0, 0)))           # only pass over x, only if ragged

    # ---- pack params into two slabs (2 DMAs instead of 2*n_layers) ------
    F_out_pad = _round_up(max(fo for fo, _ in layer_dims), 8)
    F_in_pad = _round_up(max(fi for _, fi in layer_dims), 128)
    w_dtype = jnp.dtype(mxu_dtype)                         # pre-cast once in wrapper
    w_slab = jnp.zeros((n_layers, F_out_pad, F_in_pad), w_dtype)
    b_slab = jnp.zeros((n_layers, F_out_pad, 1), jnp.float32)
    for i, (w, b) in enumerate(zip(weights, biases)):
        fo, fi = w.shape
        w_slab = w_slab.at[i, :fo, :fi].set(w.astype(w_dtype))
        b_slab = b_slab.at[i, :fo, 0].set(b.astype(jnp.float32))

    in_specs = [
        pl.BlockSpec((tn, p), lambda i: (i, 0)),
        pl.BlockSpec(w_slab.shape, lambda i: (0, 0, 0)),   # constant: copied once
        pl.BlockSpec(b_slab.shape, lambda i: (0, 0, 0)),   # constant: copied once
    ]
    out_spec = pl.BlockSpec((D, tn), lambda i: (0, i))     # lane-dense output

    # ---- explicit VMEM budget (v7x: 64 MiB physical, 32 MiB scoped default)
    est = (2 * tn * p * 4                                   # x tile, double-buffered
           + w_slab.size * w_dtype.itemsize                 # weight slab
           + b_slab.size * 4                                # bias slab
           + 2 * D * tn * 4                                 # out tile, double-buffered
           + 4 * F_out_pad * tn * 4)                        # live activations
    vmem_limit = int(min(max(4 * est + (2 << 20), 8 << 20), 64 << 20))

    outT = pl.pallas_call(
        _make_mlp_kernel(layer_dims, mxu_dtype),
        out_shape=jax.ShapeDtypeStruct((D, B_pad), jnp.float32),
        grid=grid,
        in_specs=in_specs,
        out_specs=out_spec,
        compiler_params=pltpu.CompilerParams(
            dimension_semantics=("parallel",),
            vmem_limit_bytes=vmem_limit),
    )(x, w_slab, b_slab)

    # Final un-transpose only touches D*B elements (D is tiny) -> cheap.
    return outT[:, :B].T


def init_feedforward_params(key, p, K, D, depth=1, width=32):
    """Deterministic init matching the PyTorch module's layer shapes.

    Weights stored PyTorch-native (out_features, in_features); init is
    U(-1/sqrt(fan_in), 1/sqrt(fan_in)) like nn.Linear's default."""
    dims = [(p, K), (K, width)] + [(width, width)] * (depth - 1) + [(width, D)]
    weights, biases = [], []
    for (fin, fout) in dims:
        key, kw, kb = jax.random.split(key, 3)
        bound = 1.0 / jnp.sqrt(jnp.float32(fin))
        weights.append(jax.random.uniform(kw, (fout, fin), jnp.float32,
                                          minval=-bound, maxval=bound))
        biases.append(jax.random.uniform(kb, (fout,), jnp.float32,
                                         minval=-bound, maxval=bound))
    return weights, biases


def feedforward_ref(x, weights, biases):
    """Pure-JAX reference mirroring the PyTorch forward (x @ W.T + b)."""
    h = x
    n = len(weights)
    for i, (w, b) in enumerate(zip(weights, biases)):
        h = h @ w.T + b
        if i < n - 1:
            h = jnp.maximum(h, 0.0)
    return h


if __name__ == "__main__":
    # Shapes consistent with Feedforward(p=16, K=32, D=8, depth=2, width=32).
    p, K, D, depth, width = 16, 32, 8, 2, 32
    batch = 16

    key = jax.random.PRNGKey(0)
    key, kx = jax.random.split(key)
    x = jax.random.normal(kx, (batch, p), jnp.float32)
    weights, biases = init_feedforward_params(key, p, K, D, depth=depth,
                                              width=width)
    ref = feedforward_ref(x, weights, biases)

    # f32 MXU path (matches PyTorch semantics).
    out = jax.block_until_ready(feedforward_pallas(x, weights, biases))
    assert out.shape == (batch, D)
    assert jnp.allclose(out, ref, atol=1e-4, rtol=1e-4), "f32 mismatch vs ref"

    # Ragged batch (not a multiple of 128) handled by minimal padding.
    key, kr = jax.random.split(key)
    xr = jax.random.normal(kr, (19, p), jnp.float32)
    out_r = jax.block_until_ready(feedforward_pallas(xr, weights, biases))
    assert out_r.shape == (19, D)
    assert jnp.allclose(out_r, feedforward_ref(xr, weights, biases),
                        atol=1e-4, rtol=1e-4), "ragged mismatch"

    # Multi-step parallel grid path (B_pad = 384 -> 3 grid steps of tn=128).
    key, km = jax.random.split(key)
    xm = jax.random.normal(km, (257, p), jnp.float32)
    out_m = jax.block_until_ready(feedforward_pallas(xm, weights, biases))
    assert out_m.shape == (257, D)
    assert jnp.allclose(out_m, feedforward_ref(xm, weights, biases),
                        atol=1e-4, rtol=1e-4), "multi-tile mismatch"

    # Optional bf16 MXU path: weights pre-cast once in the wrapper,
    # f32 accumulation + f32 bias/ReLU.
    out_bf16 = jax.block_until_ready(
        feedforward_pallas(x, weights, biases, mxu_dtype=jnp.bfloat16))
    assert jnp.allclose(out_bf16, ref, atol=5e-2, rtol=5e-2), "bf16 mismatch"

    # TODO(synk): the `loss` method (MSE + per-column noise scaling) is
    # host-side training glue and is not implemented as a kernel.
    print("KERNEL_OK")
</pallas_src>

<mosaic_0001>
module attributes {stable_mosaic.version = 11 : i64} {
  func.func @kernel(%arg0: i32, %arg1: memref<128x16xf32, #tpu.memory_space<vmem>>, %arg2: memref<4x32x128xf32, #tpu.memory_space<vmem>>, %arg3: memref<4x32x1xf32, #tpu.memory_space<vmem>>, %arg4: memref<8x128xf32, #tpu.memory_space<vmem>>) attributes {dimension_semantics = [#tpu.dimension_semantics<parallel>], iteration_bounds = array<i64: 1>, scalar_prefetch = 0 : i64, scratch_operands = 0 : i64, tpu.core_type = #tpu.core_type<tc>, window_params = [{transform_indices = @transform_0, window_bounds = array<i64: 128, 16>}, {pipeline_mode = #tpu.pipeline_mode<synchronous>, transform_indices = @transform_1, window_bounds = array<i64: 4, 32, 128>}, {pipeline_mode = #tpu.pipeline_mode<synchronous>, transform_indices = @transform_2, window_bounds = array<i64: 4, 32, 1>}, {transform_indices = @transform_3, window_bounds = array<i64: 8, 128>}]} {
    %c0 = arith.constant 0 : index
    %c0_0 = arith.constant 0 : index
    %0 = vector.load %arg1[%c0, %c0_0] : memref<128x16xf32, #tpu.memory_space<vmem>>, vector<128x16xf32>
    %c0_1 = arith.constant 0 : index
    %c0_2 = arith.constant 0 : index
    %c0_3 = arith.constant 0 : index
    %1 = vector.load %arg2[%c0_1, %c0_2, %c0_3] : memref<4x32x128xf32, #tpu.memory_space<vmem>>, vector<1x32x16xf32>
    %2 = vector.shape_cast %1 : vector<1x32x16xf32> to vector<32x16xf32>
    %cst = arith.constant dense<0.000000e+00> : vector<32x128xf32>
    %3 = tpu.matmul %2, %0, %cst {dimension_numbers = #tpu.dot_dimension_numbers<[1], [1], [0], [0], [0, 0, 1, 0], [], []>} : vector<32x16xf32>, vector<128x16xf32>, vector<32x128xf32> -> vector<32x128xf32>
    %c0_4 = arith.constant 0 : index
    %c0_5 = arith.constant 0 : index
    %c0_6 = arith.constant 0 : index
    %4 = vector.load %arg3[%c0_4, %c0_5, %c0_6] : memref<4x32x1xf32, #tpu.memory_space<vmem>>, vector<1x32x1xf32>
    %5 = vector.shape_cast %4 : vector<1x32x1xf32> to vector<32x1xf32>
    %6 = vector.broadcast %5 : vector<32x1xf32> to vector<32x128xf32>
    %7 = arith.addf %3, %6 : vector<32x128xf32>
    %cst_7 = arith.constant 0.000000e+00 : f32
    %8 = vector.broadcast %cst_7 : f32 to vector<32x128xf32>
    %9 = arith.maximumf %7, %8 : vector<32x128xf32>
    %c1 = arith.constant 1 : index
    %c0_8 = arith.constant 0 : index
    %c0_9 = arith.constant 0 : index
    %10 = vector.load %arg2[%c1, %c0_8, %c0_9] : memref<4x32x128xf32, #tpu.memory_space<vmem>>, vector<1x32x32xf32>
    %11 = vector.shape_cast %10 : vector<1x32x32xf32> to vector<32x32xf32>
    %cst_10 = arith.constant dense<0.000000e+00> : vector<32x128xf32>
    %12 = tpu.matmul %11, %9, %cst_10 {dimension_numbers = #tpu.dot_dimension_numbers<[1], [0], [0], [1], [0, 0, 1, 1], [], []>} : vector<32x32xf32>, vector<32x128xf32>, vector<32x128xf32> -> vector<32x128xf32>
    %c1_11 = arith.constant 1 : index
    %c0_12 = arith.constant 0 : index
    %c0_13 = arith.constant 0 : index
    %13 = vector.load %arg3[%c1_11, %c0_12, %c0_13] : memref<4x32x1xf32, #tpu.memory_space<vmem>>, vector<1x32x1xf32>
    %14 = vector.shape_cast %13 : vector<1x32x1xf32> to vector<32x1xf32>
    %15 = vector.broadcast %14 : vector<32x1xf32> to vector<32x128xf32>
    %16 = arith.addf %12, %15 : vector<32x128xf32>
    %cst_14 = arith.constant 0.000000e+00 : f32
    %17 = vector.broadcast %cst_14 : f32 to vector<32x128xf32>
    %18 = arith.maximumf %16, %17 : vector<32x128xf32>
    %c2 = arith.constant 2 : index
    %c0_15 = arith.constant 0 : index
    %c0_16 = arith.constant 0 : index
    %19 = vector.load %arg2[%c2, %c0_15, %c0_16] : memref<4x32x128xf32, #tpu.memory_space<vmem>>, vector<1x32x32xf32>
    %20 = vector.shape_cast %19 : vector<1x32x32xf32> to vector<32x32xf32>
    %cst_17 = arith.constant dense<0.000000e+00> : vector<32x128xf32>
    %21 = tpu.matmul %20, %18, %cst_17 {dimension_numbers = #tpu.dot_dimension_numbers<[1], [0], [0], [1], [0, 0, 1, 1], [], []>} : vector<32x32xf32>, vector<32x128xf32>, vector<32x128xf32> -> vector<32x128xf32>
    %c2_18 = arith.constant 2 : index
    %c0_19 = arith.constant 0 : index
    %c0_20 = arith.constant 0 : index
    %22 = vector.load %arg3[%c2_18, %c0_19, %c0_20] : memref<4x32x1xf32, #tpu.memory_space<vmem>>, vector<1x32x1xf32>
    %23 = vector.shape_cast %22 : vector<1x32x1xf32> to vector<32x1xf32>
    %24 = vector.broadcast %23 : vector<32x1xf32> to vector<32x128xf32>
    %25 = arith.addf %21, %24 : vector<32x128xf32>
    %cst_21 = arith.constant 0.000000e+00 : f32
    %26 = vector.broadcast %cst_21 : f32 to vector<32x128xf32>
    %27 = arith.maximumf %25, %26 : vector<32x128xf32>
    %c3 = arith.constant 3 : index
    %c0_22 = arith.constant 0 : index
    %c0_23 = arith.constant 0 : index
    %28 = vector.load %arg2[%c3, %c0_22, %c0_23] : memref<4x32x128xf32, #tpu.memory_space<vmem>>, vector<1x8x32xf32>
    %29 = vector.shape_cast %28 : vector<1x8x32xf32> to vector<8x32xf32>
    %cst_24 = arith.constant dense<0.000000e+00> : vector<8x128xf32>
    %30 = tpu.matmul %29, %27, %cst_24 {dimension_numbers = #tpu.dot_dimension_numbers<[1], [0], [0], [1], [0, 0, 1, 1], [], []>} : vector<8x32xf32>, vector<32x128xf32>, vector<8x128xf32> -> vector<8x128xf32>
    %c3_25 = arith.constant 3 : index
    %c0_26 = arith.constant 0 : index
    %c0_27 = arith.constant 0 : index
    %31 = vector.load %arg3[%c3_25, %c0_26, %c0_27] : memref<4x32x1xf32, #tpu.memory_space<vmem>>, vector<1x8x1xf32>
    %32 = vector.shape_cast %31 : vector<1x8x1xf32> to vector<8x1xf32>
    %33 = vector.broadcast %32 : vector<8x1xf32> to vector<8x128xf32>
    %34 = arith.addf %30, %33 : vector<8x128xf32>
    %c0_28 = arith.constant 0 : index
    %c0_29 = arith.constant 0 : index
    %35 = vector.load %arg4[%c0_28, %c0_29] : memref<8x128xf32, #tpu.memory_space<vmem>>, vector<8x128xf32>
    tpu.vector_store %arg4[%c0_28, %c0_29], %34 {strides = array<i32>} : memref<8x128xf32, #tpu.memory_space<vmem>>, vector<8x128xf32>,
    return
  }
  func.func @transform_0(%arg0: i32) -> (i32, i32) {
    %c0_i32 = arith.constant 0 : i32
    %c0_i32_0 = arith.constant 0 : i32
    return %arg0, %c0_i32 : i32, i32
  }
  func.func @transform_1(%arg0: i32) -> (i32, i32, i32) {
    %c0_i32 = arith.constant 0 : i32
    %c0_i32_0 = arith.constant 0 : i32
    %c0_i32_1 = arith.constant 0 : i32
    %c0_i32_2 = arith.constant 0 : i32
    return %c0_i32, %c0_i32_0, %c0_i32_1 : i32, i32, i32
  }
  func.func @transform_2(%arg0: i32) -> (i32, i32, i32) {
    %c0_i32 = arith.constant 0 : i32
    %c0_i32_0 = arith.constant 0 : i32
    %c0_i32_1 = arith.constant 0 : i32
    %c0_i32_2 = arith.constant 0 : i32
    return %c0_i32, %c0_i32_0, %c0_i32_1 : i32, i32, i32
  }
  func.func @transform_3(%arg0: i32) -> (i32, i32) {
    %c0_i32 = arith.constant 0 : i32
    %c0_i32_0 = arith.constant 0 : i32
    return %c0_i32, %arg0 : i32, i32
  }
}

</mosaic_0001>

<bundles_post_ra>
// kernel: tpu_custom_call.1
= control target key start
LH: loop header
LB: loop body
LE: loop exit
PB: predicated region body
PF: predicated region fallthrough
CT: control target
= control target key end

     0   :  { %vm59_vm0 = vcmask 130048   ;;  %v835_v6 = vmov 0   ;;  %s1049_s0 = inlined_call_operand.vmem [shape: f32[128,16], index: 0, kind: input, shape index: {}]   ;;  %s1050_s1 = inlined_call_operand.vmem [shape: f32[4,32,128], index: 1, kind: input, shape index: {}]   ;;  %s1051_s2 = inlined_call_operand.vmem [shape: f32[4,32,1], index: 2, kind: input, shape index: {}]   ;;  %s1052_s3 = inlined_call_operand.hbm [shape: f32[8,128], index: 3, kind: output, shape index: {}]  }
   0x1   :  { %v15_v0 = vld [vmem:[%s1049_s0] sm:$0xff]  ;;  %v16_v1 = vld [vmem:[%s1049_s0 + $0x8] sm:$0xff]  ;;  %v17_v2 = vld [vmem:[%s1049_s0 + $0x10] sm:$0xff]  ;;  %809 = vset.pattern.permute.xlu0 %v835_v6  ;;  %810 = vset.pattern.permute.xlu1 %v835_v6 }
   0x2   :  { %v734_v3 = vpack.c.bf16 %v16_v1, %v15_v0  ;;  %vm871_vm1 = vmpackc.low %vm59_vm0, %vm59_vm0  ;;  %v18_v5 = vld [vmem:[%s1049_s0 + $0x18] sm:$0xff]  ;;  %v31_v8 = vld [vmem:[%s1050_s1] sm:$0xff] }
   0x3   :  { %v740_v7 = vpack.c.bf16 %v18_v5, %v17_v2  ;;  %v19_v9 = vld [vmem:[%s1049_s0 + $0x20] sm:$0xff]  ;;  %v20_v10 = vld [vmem:[%s1049_s0 + $0x28] sm:$0xff]  ;;  %689 = vmatprep.mubr.msk.f32.mxu0 %vm59_vm0, %v31_v8  ;;  %v37_v12 = vld [vmem:[%s1051_s2 + $0x10] sm:$0xff] }
   0x4   :  { %736 = vmatprep.subr.msk.bf16.mxu0 %vm871_vm1, %v734_v3  ;;  %v35_v11 = vld [vmem:[%s1051_s2] sm:$0xff]  ;;  %51 = vperm.xlu1 %810, %v37_v12   ;;  %v746_v13 = vpack.c.bf16 %v20_v10, %v19_v9  ;;  %v36_v14 = vld [vmem:[%s1051_s2 + $0x8] sm:$0xff]  ;;  %v38_v15 = vld [vmem:[%s1051_s2 + $0x18] sm:$0xff] }
   0x5   :  { %739 = vmatpush3.bf16.xpose.msk.msra.mxu0 %vm871_vm1, %v734_v3  ;;  %41 = vperm.xlu0 %809, %v35_v11  }
   0x6   :  { %742 = vmatprep.subr.msk.bf16.mxu0 %vm871_vm1, %v740_v7 }
   0x7   :  { %8 = vsyncpa [#allocation3], 0  ;;  %v593_v16 = vld [vmem:[%s1051_s2 + $0x20] sm:$0xff]  ;;  %v21_v17 = vld [vmem:[%s1049_s0 + $0x30] sm:$0xff]  ;;  %vm239_vm2 = vcmask 261120   ;;  %vm837_vm3 = vmmov 0  }
   0x8   :  { %56 = vperm.xlu1 %810, %v38_v15   ;;  %v22_v18 = vld [vmem:[%s1049_s0 + $0x38] sm:$0xff]  ;;  %v594_v19 = vld [vmem:[%s1051_s2 + $0x28] sm:$0xff]  ;;  %v595_v21 = vld [vmem:[%s1051_s2 + $0x30] sm:$0xff]  ;;  %s839_s12 = smov [#allocation2]  }
   0x9   :  { %46 = vperm.xlu0 %809, %v36_v14   ;;  %v752_v20 = vpack.c.bf16 %v22_v18, %v21_v17  ;;  %v596_v22 = vld [vmem:[%s1051_s2 + $0x38] sm:$0xff]  ;;  %v605_v23 = vld [vmem:[%s1051_s2 + $0x40] sm:$0xff]  ;;  %v24_v25 = vld [vmem:[%s1049_s0 + $0x48] sm:$0xff]  ;;  %s561_s13 = sshll.u32 %s839_s12, 4  ;;  %s562_s13 = int_to_ptr.vmem [resolvable:$true] %s561_s13 }
   0xa   :  { %v23_v24 = vld [vmem:[%s1049_s0 + $0x40] sm:$0xff]  ;;  %v606_v26 = vld [vmem:[%s1051_s2 + $0x48] sm:$0xff]  ;;  %v607_v28 = vld [vmem:[%s1051_s2 + $0x50] sm:$0xff]  ;;  %s811_s14 = scalar_lea.vmem %s562_s13, 128  ;;  %p816_p1 = scmp.lt.s32.totalorder %s562_s13, %s562_s13 }
   0xb   :  { %v758_v27 = vpack.c.bf16 %v24_v25, %v23_v24  ;;  %v608_v29 = vld [vmem:[%s1051_s2 + $0x58] sm:$0xff]  ;;  %v614_v30 = vld [vmem:[%s1051_s2 + $0x60] sm:$0xff]  ;;  %v25_v31 = vld [vmem:[%s1049_s0 + $0x50] sm:$0xff]  ;;  %v838_v24 = vmov 0.0   ;;  %p812_p0 = scmp.ne.s32.totalorder %s562_s13, %s811_s14  ;;  %p817_p2 = scmp.lt.s32.totalorder %s811_s14, %s811_s14 }
   0xc   :  { %226 = vperm.xlu1 %810, %v594_v19   ;;  %v26_v32 = vld [vmem:[%s1049_s0 + $0x58] sm:$0xff]  ;;  %v27_v34 = vld [vmem:[%s1049_s0 + $0x60] sm:$0xff]  ;;  %v28_v35 = vld [vmem:[%s1049_s0 + $0x68] sm:$0xff] }
   0xd   :  { %745 = vmatpush3.bf16.xpose.msk.msra.mxu0 %vm871_vm1, %v740_v7  ;;  %221 = vperm.xlu0 %809, %v593_v16   ;;  %v764_v33 = vpack.c.bf16 %v26_v32, %v25_v31  ;;  %v770_v36 = vpack.c.bf16 %v28_v35, %v27_v34  ;;  %v29_v37 = vld [vmem:[%s1049_s0 + $0x70] sm:$0xff]  ;;  %v30_v38 = vld [vmem:[%s1049_s0 + $0x78] sm:$0xff]  ;;  %v32_v40 = vld [vmem:[%s1050_s1 + $0x8] sm:$0xff]  ;;  %p818_p3 = por %p817_p2, %p816_p1 }
   0xe   :  { %748 = vmatprep.subr.msk.bf16.mxu0 %vm871_vm1, %v746_v13  ;;  %v776_v39 = vpack.c.bf16 %v30_v38, %v29_v37  ;;  %v33_v41 = vld [vmem:[%s1050_s1 + $0x10] sm:$0xff]  ;;  %v34_v42 = vld [vmem:[%s1050_s1 + $0x18] sm:$0xff]  ;;  %v589_v43 = vld [vmem:[%s1050_s1 + $0x20] sm:$0xff] }
   0xf   :  { %703 = vmatprep.mubr.msk.f32.mxu1 %vm239_vm2, %v589_v43  ;;  %v590_v62 = vld [vmem:[%s1050_s1 + $0x28] sm:$0xff]  ;;  %v591_v63 = vld [vmem:[%s1050_s1 + $0x30] sm:$0xff]  ;;  %v592_v0 = vld [vmem:[%s1050_s1 + $0x38] sm:$0xff]  ;;  %p819_p4 = pnand %p818_p3, %p812_p0 }
  0x10   :  { %236 = vperm.xlu1 %810, %v596_v22   ;;  %v601_v1 = vld [vmem:[%s1050_s1 + $0x40] sm:$0xff]  ;;  %v604_v22 = vld [vmem:[%s1050_s1 + $0x58] sm:$0xff] }
  0x11   :  { %231 = vperm.xlu0 %809, %v595_v21   ;;  %v603_v21 = vld [vmem:[%s1050_s1 + $0x50] sm:$0xff]  ;;  %v613_v43 = vld [vmem:[%s1050_s1 + $0x60] sm:$0xff] }
  0x14   :  { %358 = vperm.xlu1 %810, %v606_v26  }
  0x15   :  { %751 = vmatpush3.bf16.xpose.msk.msra.mxu0 %vm871_vm1, %v746_v13  ;;  %353 = vperm.xlu0 %809, %v605_v23   ;;  %v836_v23 = vmov 0.0|0.0  }
  0x16   :  { %754 = vmatprep.subr.msk.bf16.mxu0 %vm871_vm1, %v752_v20 }
  0x18   :  { %368 = vperm.xlu1 %810, %v608_v29  }
  0x19   :  { %363 = vperm.xlu0 %809, %v607_v28  }
  0x1d   :  { %757 = vmatpush3.bf16.xpose.msk.msra.mxu0 %vm871_vm1, %v752_v20  ;;  %478 = vperm.xlu0 %809, %v614_v30   ;;  %v602_v20 = vld [vmem:[%s1050_s1 + $0x48] sm:$0xff] }
  0x1e   :  { %760 = vmatprep.subr.msk.bf16.mxu0 %vm871_vm1, %v758_v27 }
  0x25   :  { %763 = vmatpush3.bf16.xpose.msk.msra.mxu0 %vm871_vm1, %v758_v27 }
  0x26   :  { %766 = vmatprep.subr.msk.bf16.mxu0 %vm871_vm1, %v764_v33 }
  0x2d   :  { %769 = vmatpush3.bf16.xpose.msk.msra.mxu0 %vm871_vm1, %v764_v33 }
  0x2e   :  { %772 = vmatprep.subr.msk.bf16.mxu0 %vm871_vm1, %v770_v36 }
  0x35   :  { %775 = vmatpush3.bf16.xpose.msk.msra.mxu0 %vm871_vm1, %v770_v36 }
  0x36   :  { %778 = vmatprep.subr.msk.bf16.mxu0 %vm871_vm1, %v776_v39 }
  0x3d   :  { %781 = vmatpush3.bf16.xpose.msk.msra.mxu0 %vm871_vm1, %v776_v39 }
  0x44   :  { %690 = vmatmul.mubr.msk.f32.vlgmr.msra.gmra.mrb[0].mxu0 %vm59_vm0, %v32_v40 }
  0x45   :  { %692 = vmatprep.mubr.msk.f32.mxu0 %vm59_vm0, %v33_v41 }
  0x48   :  { %693 = vmatmul.mubr.msk.f32.gmra.mrb[2].mxu0 %vm59_vm0, %v34_v42 }
  0x83   :  { %v52_v45 = vpop.permute.xlu1 %51 }
  0x84   :  { %v42_v44 = vpop.permute.xlu0 %41 }
  0x87   :  { %v57_v52 = vpop.permute.xlu1 %56 }
  0x88   :  { %v47_v46 = vpop.permute.xlu0 %46 }
  0x8b   :  { %v227_v2 = vpop.permute.xlu1 %226 }
  0x8c   :  { %v222_v3 = vpop.permute.xlu0 %221 }
  0x8f   :  { %v237_v9 = vpop.permute.xlu1 %236 }
  0x90   :  { %v232_v12 = vpop.permute.xlu0 %231 }
  0x93   :  { %v359_v25 = vpop.permute.xlu1 %358 }
  0x94   :  { %v354_v26 = vpop.permute.xlu0 %353 }
  0x97   :  { %v369_v32 = vpop.permute.xlu1 %368 }
  0x98   :  { %v364_v35 = vpop.permute.xlu0 %363 }
 0x117   :  { %v691_v47 = vpop.f32.mrb[0].mxu0 }
 0x118   :  { %v192_v48 = vadd.f32 %v691_v47, %v47_v46  ;;  %v186_v49 = vpop.f32.mrb[1].mxu0 }
 0x119   :  { %v187_v50 = vadd.f32 %v186_v49, %v42_v44  ;;  %v479_v44 = vpop.permute.xlu0 %478 }
 0x11a   :  { %v206_v51 = vmax.f32 %v192_v48, 0.0 }
 0x11b   :  { %v205_v53 = vmax.f32 %v187_v50, 0.0  ;;  %v694_v54 = vpop.f32.mrb[2].mxu0 }
 0x11c   :  { %v202_v55 = vadd.f32 %v694_v54, %v57_v52  ;;  %v196_v56 = vpop.f32.mrb[3].mxu0 }
 0x11d   :  { %v197_v57 = vadd.f32 %v196_v56, %v52_v45  ;;  %v782_v58 = vpack.c.bf16 %v206_v51, %v205_v53 }
 0x11e   :  { %v208_v59 = vmax.f32 %v202_v55, 0.0 }
 0x11f   :  { %v207_v60 = vmax.f32 %v197_v57, 0.0  ;;  %783 = vmatprep.subr.bf16.mxu1 %v782_v58 }
 0x120   :  { %785 = vmatpush3.bf16.msra.mxu1 %v782_v58 }
 0x121   :  { %v786_v61 = vpack.c.bf16 %v208_v59, %v207_v60 }
 0x123   :  { %787 = vmatprep.subr.bf16.mxu1 %v786_v61 }
 0x124   :  { %789 = vmatpush3.bf16.msra.mxu1 %v786_v61 }
 0x127   :  { %704 = vmatmul.mubr.msk.f32.vlgmr.msra.gmra.mrb[0].mxu1 %vm239_vm2, %v590_v62 }
 0x128   :  { %706 = vmatprep.mubr.msk.f32.mxu1 %vm239_vm2, %v591_v63 }
 0x12b   :  { %707 = vmatmul.mubr.msk.f32.gmra.mrb[2].mxu1 %vm239_vm2, %v592_v0 }
 0x12c   :  { %717 = vmatprep.mubr.msk.f32.mxu1 %vm239_vm2, %v601_v1 }
 0x1fa   :  { %v705_v4 = vpop.f32.mrb[0].mxu1 }
 0x1fb   :  { %v324_v5 = vadd.f32 %v705_v4, %v227_v2  ;;  %v318_v6 = vpop.f32.mrb[1].mxu1 }
 0x1fc   :  { %v319_v7 = vadd.f32 %v318_v6, %v222_v3 }
 0x1fd   :  { %v338_v8 = vmax.f32 %v324_v5, 0.0 }
 0x1fe   :  { %v337_v10 = vmax.f32 %v319_v7, 0.0  ;;  %v708_v11 = vpop.f32.mrb[2].mxu1 }
 0x1ff   :  { %v334_v13 = vadd.f32 %v708_v11, %v237_v9  ;;  %v328_v14 = vpop.f32.mrb[3].mxu1 }
 0x200   :  { %v790_v15 = vpack.c.bf16 %v338_v8, %v337_v10  ;;  %v329_v16 = vadd.f32 %v328_v14, %v232_v12 }
 0x201   :  { %v340_v17 = vmax.f32 %v334_v13, 0.0 }
 0x202   :  { %v339_v18 = vmax.f32 %v329_v16, 0.0  ;;  %791 = vmatprep.subr.bf16.mxu1 %v790_v15 }
 0x203   :  { %793 = vmatpush3.bf16.msra.mxu1 %v790_v15 }
 0x204   :  { %v794_v19 = vpack.c.bf16 %v340_v17, %v339_v18 }
 0x206   :  { %795 = vmatprep.subr.bf16.mxu1 %v794_v19 }
 0x207   :  { %797 = vmatpush3.bf16.msra.mxu1 %v794_v19 }
 0x208   :  { %798 = vmatprep.subr.bf16.mxu1 %v836_v23 }
 0x20a   :  { %718 = vmatmul.mubr.msk.f32.vlgmr.msra.gmra.mrb[4].mxu1 %vm239_vm2, %v602_v20 }
 0x20b   :  { %720 = vmatprep.mubr.msk.f32.mxu1 %vm239_vm2, %v603_v21 }
 0x20e   :  { %721 = vmatmul.mubr.msk.f32.gmra.mrb[6].mxu1 %vm239_vm2, %v604_v22 }
 0x20f   :  { %731 = vmatprep.mubr.msk.f32.mxu1 %vm837_vm3, %v838_v24 }
 0x2dd   :  { %v719_v27 = vpop.f32.mrb[4].mxu1 }
 0x2de   :  { %v455_v28 = vadd.f32 %v719_v27, %v359_v25  ;;  %v449_v29 = vpop.f32.mrb[5].mxu1 }
 0x2df   :  { %v450_v30 = vadd.f32 %v449_v29, %v354_v26 }
 0x2e0   :  { %v469_v31 = vmax.f32 %v455_v28, 0.0 }
 0x2e1   :  { %v468_v33 = vmax.f32 %v450_v30, 0.0  ;;  %v722_v34 = vpop.f32.mrb[6].mxu1 }
 0x2e2   :  { %v465_v36 = vadd.f32 %v722_v34, %v369_v32  ;;  %v459_v37 = vpop.f32.mrb[7].mxu1 }
 0x2e3   :  { %v799_v38 = vpack.c.bf16 %v469_v31, %v468_v33  ;;  %v460_v39 = vadd.f32 %v459_v37, %v364_v35 }
 0x2e4   :  { %v471_v40 = vmax.f32 %v465_v36, 0.0 }
 0x2e5   :  { %v470_v41 = vmax.f32 %v460_v39, 0.0  ;;  %800 = vmatpush3.bf16.msra.mxu1 %v799_v38 }
 0x2e6   :  { %801 = vmatprep.subr.bf16.mxu1 %v836_v23 }
 0x2e7   :  { %v802_v42 = vpack.c.bf16 %v471_v40, %v470_v41 }
 0x2e9   :  { %803 = vmatpush3.bf16.msra.mxu1 %v802_v42 }
 0x2ec   :  { %732 = vmatmul.mubr.msk.f32.vlgmr.msra.gmra.mrb[8].mxu1 %vm239_vm2, %v613_v43 }
 0x3bf   :  { %v550_v45 = vpop.f32.mrb[8].mxu1 }
 0x3c0   :  { %v551_v46 = vadd.f32 %v550_v45, %v479_v44  ;;  %v733_v47 = vpop.f32.mrb[9].mxu1 }
 0x3c2   :  { %554 = vst [vmem:[#allocation2] sm:$0xff] %v551_v46 }
 0x3c3   :  { %822 = shalt.err (!%p819_p4)
}
 0x3c4   :  { %s823_s1 = scalar_lea.hbm %s1052_s3, 128 }
 0x3c5   :  { %p824_p5 = scmp.ne.s32.totalorder %s1052_s3, %s823_s1  ;;  %p827_p6 = scmp.lt.u32.totalorder %s823_s1, %s1052_s3 }
 0x3c7   :  { %p829_p7 = pnand %p827_p6, %p824_p5 }
 0x3c9   :  { %832 = shalt.err (!%p829_p7)
}
 0x3ca   :  { %564 = dma.vmem_to_hbm [thread:$0]  %s562_s13, 128, %s1052_s3, [#allocation3]  }
 0x3cb   :  { %833 = dma.done.wait [#allocation3], 128  }
 0x3cc   :  { %834 = vsyncadd [#allocation3], 4294967168 }
 0x3cd   :  { %568 = vsyncpa [#allocation3], 1 }

</bundles_post_ra>
